<compile_context>
chip_gen: v7x
topology: tpu7x:2x2x1
jax: 0.10.0
libtpu: 0.0.40
codegen_flags: <defaults>
</compile_context>

<pallas_src>
import jax
import jax.numpy as jnp
from jax import lax
from jax.experimental import pallas as pl
from jax.experimental.pallas import tpu as pltpu

LANES = 128
SUB_F32 = 8                              # f32 sublanes per vreg
TARGET_BLOCK_BYTES = 4 * 1024 * 1024     # ~4 MiB of input per pipeline buffer

_CORE_PARALLEL = getattr(pltpu, "CORE_PARALLEL", None)


def _device_kind():
    try:
        return jax.devices()[0].device_kind.lower()
    except Exception:
        return ""


def _default_num_cores():
    # v7x has 2 TensorCores per chip; v5e/v6e have 1 (a 2-way split there is
    # just a serial loop plus phantom-block overhead).
    kind = _device_kind()
    return 2 if "v7" in kind else 1


def _has_bf16_eup():
    kind = _device_kind()
    return ("v6" in kind) or ("v7" in kind)


def _make_kernel(row_tile, acc_rows, rows, bpc, needs_mask, compute_dtype,
                 negate_in_kernel):
    groups = row_tile // acc_rows

    def accumulate(x, acc_ref):
        # log on the EUP (bf16 on v6e/v7x when the input is bf16, else f32);
        # accumulate in f32. Vreg-group VALU adds into `acc_rows // 8`
        # independent chains; no per-iteration cross-lane reduce.
        logs = jnp.log(x).astype(jnp.float32)
        acc_ref[...] += logs.reshape(groups, acc_rows, LANES).sum(axis=0)

    def kernel(x_ref, o_ref, acc_ref):
        c = pl.program_id(0)      # core / partial-sum index
        i = pl.program_id(1)      # block index within this core

        @pl.when(i == 0)
        def _():
            acc_ref[...] = jnp.zeros_like(acc_ref)

        if not needs_mask:
            accumulate(x_ref[...].astype(compute_dtype), acc_ref)
        else:
            blk = c * bpc + i
            is_tail = (blk + 1) * row_tile > rows

            @pl.when(jnp.logical_not(is_tail))
            def _():
                # Fast path: interior blocks never pay the mask.
                accumulate(x_ref[...].astype(compute_dtype), acc_ref)

            @pl.when(is_tail)
            def _():
                # Last real (partial) block and phantom blocks: rows >= `rows`
                # are forced to 1.0 (log(1) = 0). Phantom blocks re-read a
                # clamped valid block (see index_map) and mask out entirely.
                row0 = blk * row_tile
                gid = lax.broadcasted_iota(jnp.int32, (row_tile, LANES), 0) + row0
                x = x_ref[...].astype(compute_dtype)
                x = jnp.where(gid < rows, x, jnp.ones_like(x))
                accumulate(x, acc_ref)

        @pl.when(i == pl.num_programs(1) - 1)
        def _():
            total = jnp.sum(acc_ref[...])          # single cross-lane reduce
            o_ref[0, 0] = -total if negate_in_kernel else total

    return kernel


def instance_discrimination_loss(predictions, *, block_bytes=TARGET_BLOCK_BYTES,
                                 num_cores=None, low_precision_log=None,
                                 core_parallel=None):
    """-sum(log(predictions)) computed by a Pallas TPU kernel (returns f32 scalar)."""
    if num_cores is None:
        num_cores = _default_num_cores()

    dtype = predictions.dtype
    itemsize = jnp.dtype(dtype).itemsize
    # dtype-native sublane tile: f32 -> 8, bf16 -> 16, int8/fp8 -> 32.
    sub = SUB_F32 * max(1, 4 // max(itemsize, 1))

    flat = predictions.reshape(-1)
    n = flat.shape[0]

    # Pad the flat length to the dtype-native (sub, 128) tile so it reshapes
    # (for free when already aligned) to a lane-dense slab; pad value 1.0 ->
    # log(1) = 0, so the sum is unchanged.
    chunk = sub * LANES
    pad = (-n) % chunk
    if pad:
        flat = jnp.concatenate([flat, jnp.ones((pad,), dtype)])
    rows = flat.shape[0] // LANES
    x2d = flat.reshape(rows, LANES)

    # ~block_bytes of input per buffer, rounded down to the native tile.
    max_row_tile = max(sub, (block_bytes // (LANES * itemsize)) // sub * sub)
    row_tile = min(max_row_tile, rows)

    nblocks = pl.cdiv(rows, row_tile)
    ncores = num_cores if nblocks >= num_cores else 1
    bpc = pl.cdiv(nblocks, ncores)                 # blocks per core
    needs_mask = (ncores * bpc * row_tile) != rows

    # Interleaved partial accumulators (up to 8 vregs -> independent VALU
    # add chains); must divide row_tile (row_tile is a multiple of `sub`).
    acc_rows = next(r for r in (64, 32, 16, 8) if row_tile % r == 0)

    if low_precision_log is None:
        low_precision_log = (dtype == jnp.bfloat16) and _has_bf16_eup()
    compute_dtype = dtype if low_precision_log else jnp.float32

    negate_in_kernel = (ncores == 1)

    kernel = _make_kernel(row_tile, acc_rows, rows, bpc, needs_mask,
                          compute_dtype, negate_in_kernel)

    def in_index(c, i):
        # Clamp so phantom blocks (uneven split) re-read a valid block; their
        # contribution is masked to zero inside the kernel's tail path.
        return (jnp.minimum(c * bpc + i, nblocks - 1), 0)

    if core_parallel is None:
        core_parallel = (ncores > 1 and _CORE_PARALLEL is not None
                         and "v7" in _device_kind())
    lead_sem = _CORE_PARALLEL if core_parallel else "parallel"

    streamed_elems = ncores * bpc * row_tile * LANES     # includes re-reads
    cost = pl.CostEstimate(
        flops=2 * streamed_elems,
        transcendentals=streamed_elems,
        bytes_accessed=streamed_elems * itemsize + 4 * ncores,
    )

    partials = pl.pallas_call(
        kernel,
        out_shape=jax.ShapeDtypeStruct((ncores, 1), jnp.float32),
        grid_spec=pltpu.PrefetchScalarGridSpec(
            num_scalar_prefetch=0,
            grid=(ncores, bpc),
            in_specs=[pl.BlockSpec((row_tile, LANES), in_index)],
            out_specs=pl.BlockSpec((1, 1), lambda c, i: (c, 0),
                                   memory_space=pltpu.SMEM),
            scratch_shapes=[pltpu.VMEM((acc_rows, LANES), jnp.float32)],
        ),
        compiler_params=pltpu.CompilerParams(
            dimension_semantics=(lead_sem, "arbitrary"),
            vmem_limit_bytes=32 * 1024 * 1024),
        cost_estimate=cost,
    )(x2d)

    if ncores == 1:
        return partials[0, 0]          # already negated inside the kernel
    return -jnp.sum(partials)


if __name__ == "__main__":
    key = jax.random.PRNGKey(0)
    k1, k2, k3 = jax.random.split(key, 3)

    # Primary small shape implied by the module: (N, C, H, W) = (2, 4, 16, 16).
    x = jax.random.uniform(k1, (2, 4, 16, 16), jnp.float32, 1e-3, 1.0)
    loss = jax.block_until_ready(instance_discrimination_loss(x))
    ref = -jnp.sum(jnp.log(x))
    assert jnp.allclose(loss, ref, rtol=1e-5, atol=1e-5), (loss, ref)

    # Multi-block accumulation + 2-way partial-sum split + gated tail /
    # phantom-block masking with a tiny block (same code path that large
    # inputs take with 4 MiB blocks). core_parallel forced off so the test is
    # portable to single-TC chips.
    x2 = jax.random.uniform(k2, (3, 1, 32, 32), jnp.float32, 1e-3, 1.0)
    loss2 = jax.block_until_ready(instance_discrimination_loss(
        x2, block_bytes=8 * LANES * 4, num_cores=2, core_parallel=False))
    ref2 = -jnp.sum(jnp.log(x2))
    assert jnp.allclose(loss2, ref2, rtol=1e-5, atol=1e-5), (loss2, ref2)

    # Ragged-numel (wrapper pad) path.
    x3 = jax.random.uniform(k3, (2, 3, 5, 7), jnp.float32, 1e-3, 1.0)
    loss3 = jax.block_until_ready(instance_discrimination_loss(x3))
    ref3 = -jnp.sum(jnp.log(x3))
    assert jnp.allclose(loss3, ref3, rtol=1e-5, atol=1e-5), (loss3, ref3)

    print("KERNEL_OK")
</pallas_src>

<mosaic_0001>
module attributes {stable_mosaic.version = 11 : i64} {
  func.func @kernel(%arg0: i32, %arg1: i32, %arg2: memref<16x128xf32, #tpu.memory_space<vmem>>, %arg3: memref<1x1xf32, #tpu.memory_space<smem>>, %arg4: memref<16x128xf32, #tpu.memory_space<vmem>>) attributes {dimension_semantics = [#tpu.dimension_semantics<parallel>, #tpu.dimension_semantics<arbitrary>], iteration_bounds = array<i64: 1, 1>, scalar_prefetch = 0 : i64, scratch_operands = 1 : i64, tpu.core_type = #tpu.core_type<tc>, window_params = [{transform_indices = @transform_0, window_bounds = array<i64: 16, 128>}, {transform_indices = @transform_1, window_bounds = array<i64: 1, 1>}]} {
    %c0_i32 = arith.constant 0 : i32
    %0 = arith.cmpi eq, %arg1, %c0_i32 : i32
    %1 = arith.extui %0 : i1 to i32
    %c0_i32_0 = arith.constant 0 : i32
    %2 = arith.cmpi ne, %1, %c0_i32_0 : i32
    scf.if %2 {
      %cst_8 = arith.constant 0.000000e+00 : f32
      %13 = vector.broadcast %cst_8 : f32 to vector<16x128xf32>
      %c0_9 = arith.constant 0 : index
      %c0_10 = arith.constant 0 : index
      %14 = vector.load %arg4[%c0_9, %c0_10] : memref<16x128xf32, #tpu.memory_space<vmem>>, vector<16x128xf32>
      tpu.vector_store %arg4[%c0_9, %c0_10], %13 {strides = array<i32>} : memref<16x128xf32, #tpu.memory_space<vmem>>, vector<16x128xf32>,
    } else {
    }
    %c0 = arith.constant 0 : index
    %c0_1 = arith.constant 0 : index
    %3 = vector.load %arg2[%c0, %c0_1] : memref<16x128xf32, #tpu.memory_space<vmem>>, vector<16x128xf32>
    %4 = math.log %3 : vector<16x128xf32>
    %c0_2 = arith.constant 0 : index
    %c0_3 = arith.constant 0 : index
    %5 = vector.load %arg4[%c0_2, %c0_3] : memref<16x128xf32, #tpu.memory_space<vmem>>, vector<16x128xf32>
    %6 = vector.shape_cast %4 : vector<16x128xf32> to vector<1x16x128xf32>
    %cst = arith.constant dense<0.000000e+00> : vector<16x128xf32>
    %7 = vector.multi_reduction <add>, %6, %cst [0] : vector<1x16x128xf32> to vector<16x128xf32>
    %8 = arith.addf %5, %7 : vector<16x128xf32>
    %c0_4 = arith.constant 0 : index
    %c0_5 = arith.constant 0 : index
    %9 = vector.load %arg4[%c0_4, %c0_5] : memref<16x128xf32, #tpu.memory_space<vmem>>, vector<16x128xf32>
    tpu.vector_store %arg4[%c0_4, %c0_5], %8 {strides = array<i32>} : memref<16x128xf32, #tpu.memory_space<vmem>>, vector<16x128xf32>,
    %c0_i32_6 = arith.constant 0 : i32
    %10 = arith.cmpi eq, %arg1, %c0_i32_6 : i32
    %11 = arith.extui %10 : i1 to i32
    %c0_i32_7 = arith.constant 0 : i32
    %12 = arith.cmpi ne, %11, %c0_i32_7 : i32
    scf.if %12 {
      %c0_8 = arith.constant 0 : index
      %c0_9 = arith.constant 0 : index
      %13 = vector.load %arg4[%c0_8, %c0_9] : memref<16x128xf32, #tpu.memory_space<vmem>>, vector<16x128xf32>
      %14 = vector.shape_cast %13 : vector<16x128xf32> to vector<1x16x128xf32>
      %cst_10 = arith.constant dense<0.000000e+00> : vector<1xf32>
      %15 = vector.multi_reduction <add>, %14, %cst_10 [1, 2] : vector<1x16x128xf32> to vector<1xf32>
      %16 = vector.shape_cast %15 : vector<1xf32> to vector<1x1x1xf32>
      %17 = vector.extract %16[0, 0, 0] : f32 from vector<1x1x1xf32>
      %cst_11 = arith.constant 0.000000e+00 : f32
      %18 = arith.subf %cst_11, %17 : f32
      %c0_12 = arith.constant 0 : index
      %c0_13 = arith.constant 0 : index
      %19 = memref.load %arg3[%c0_12, %c0_13] : memref<1x1xf32, #tpu.memory_space<smem>>
      memref.store %18, %arg3[%c0_12, %c0_13] : memref<1x1xf32, #tpu.memory_space<smem>>
    } else {
    }
    return
  }
  func.func @transform_0(%arg0: i32, %arg1: i32) -> (i32, i32) {
    %c1_i32 = arith.constant 1 : i32
    %0 = arith.muli %arg0, %c1_i32 : i32
    %1 = arith.addi %0, %arg1 : i32
    %c0_i32 = arith.constant 0 : i32
    %2 = arith.minsi %1, %c0_i32 : i32
    %c0_i32_0 = arith.constant 0 : i32
    %c0_i32_1 = arith.constant 0 : i32
    return %2, %c0_i32_0 : i32, i32
  }
  func.func @transform_1(%arg0: i32, %arg1: i32) -> (i32, i32) {
    %c0_i32 = arith.constant 0 : i32
    %c0_i32_0 = arith.constant 0 : i32
    return %arg0, %c0_i32 : i32, i32
  }
}

</mosaic_0001>

<bundles_post_ra>
// kernel: tpu_custom_call.1
= control target key start
LH: loop header
LB: loop body
LE: loop exit
PB: predicated region body
PF: predicated region fallthrough
CT: control target
= control target key end

     0   :  { %6 = vsyncpa [#allocation4], 0  ;;  %s171_s0 = inlined_call_operand.hbm [shape: f32[16,128], index: 0, kind: input, shape index: {}]   ;;  %s172_s1 = inlined_call_operand.hbm [shape: f32[1,1], index: 1, kind: output, shape index: {}]  }
   0x1   :  { %7 = vsyncpa [#allocation5], 0  ;;  %s133_s6 = smov [#allocation3]   ;;  %s97_s10 = scalar_lea.hbm %s171_s0, 256 }
   0x2   :  { %s19_s7 = sshll.u32 %s133_s6, 4  ;;  %p98_p0 = scmp.ne.s32.totalorder %s171_s0, %s97_s10  ;;  %s20_s7 = int_to_ptr.vmem [resolvable:$true] %s19_s7 }
   0x3   :  { %p101_p1 = scmp.lt.u32.totalorder %s97_s10, %s171_s0 }
   0x5   :  { %p103_p2 = pnand %p101_p1, %p98_p0 }
   0x7   :  { %106 = shalt.err (!%p103_p2)
}
   0x8   :  { %s107_s15 = scalar_lea.vmem %s20_s7, 256  ;;  %p112_p4 = scmp.lt.s32.totalorder %s20_s7, %s20_s7 }
   0x9   :  { %p108_p3 = scmp.ne.s32.totalorder %s20_s7, %s107_s15  ;;  %p113_p5 = scmp.lt.s32.totalorder %s107_s15, %s107_s15 }
   0xb   :  { %p114_p6 = por %p113_p5, %p112_p4 }
   0xd   :  { %p115_p7 = pnand %p114_p6, %p108_p3 }
   0xf   :  { %118 = shalt.err (!%p115_p7)
}
  0x10   :  { %s134_s16 = smov 128   ;;  %s135_s17 = smov 8  }
  0x11   :  { %25 = dma.hbm_to_vmem [thread:$0]  %s171_s0, 256, %s20_s7, [#allocation4], %s134_s16, %s134_s16, %s135_s17  }
  0x12   :  { %129 = dma.done.wait [#allocation4], 256  }
  0x13   :  { %130 = vsyncadd [#allocation4], 4294967040  ;;  %v39_v0 = vld [vmem:[#allocation3] sm:$0xff]  ;;  %v40_v1 = vld [vmem:[#allocation3 + $0x8] sm:$0xff]  ;;  %s119_s23 = scalar_lea.hbm %s172_s1, 16 }
  0x14   :  { %93 = vlog2.f32 %v39_v0  ;;  %p120_p8 = scmp.ne.s32.totalorder %s172_s1, %s119_s23  ;;  %p123_p9 = scmp.lt.u32.totalorder %s119_s23, %s172_s1 }
  0x15   :  { %95 = vlog2.f32 %v40_v1 }
  0x16   :  { %p125_p10 = pnand %p123_p9, %p120_p8 }
  0x1e   :  { %v94_v2 = vpop.eup %93 }
  0x1f   :  { %v96_v3 = vpop.eup %95  ;;  %v42_v4 = vmul.f32 0.6931472, %v94_v2 }
  0x20   :  { %v44_v5 = vmul.f32 0.6931472, %v96_v3 }
  0x22   :  { %v58_v6 = vadd.f32 %v44_v5, %v42_v4 }
  0x24   :  { %59 = vadd.xlane.f32.xlu0 %v58_v6 }
  0xb1   :  { %v60_v7 = vpop.xlane.xlu0 %59 }
  0xb2   :  { %v61_v8 = vrot.slane %v60_v7, 4 }
  0xb4   :  { %v62_v9 = vadd.f32 %v61_v8, %v60_v7 }
  0xb6   :  { %v63_v10 = vrot.slane %v62_v9, 2 }
  0xb8   :  { %v64_v11 = vadd.f32 %v63_v10, %v62_v9 }
  0xba   :  { %v65_v12 = vrot.slane %v64_v11, 1 }
  0xbc   :  { %v66_v13 = vadd.f32 %v65_v12, %v64_v11 }
  0xbe   :  { %87 = vpush %v66_v13 }
  0xef   :  { %s88_s0 = spop %87 }
  0xf0   :  { %s68_s20 = ssub.f32 0.0, %s88_s0 }
  0xf2   :  { %70 = sst [smem:[#allocation6]] %s68_s20 }
  0xf3   :  { %128 = shalt.err (!%p125_p10)
}
  0xf4   :  { %s136_s28 = smov [#allocation6]  }
  0xf5   :  { %78 = dma.smem_to_hbm %s136_s28, 16, %s172_s1, [#allocation5]  }
  0xf6   :  { %131 = dma.done.wait [#allocation5], 16  }
  0xf7   :  { %132 = vsyncadd [#allocation5], 4294967280 }
  0xf8   :  { %82 = sfence }
  0xf9   :  { %83 = vsyncpa [#allocation4], 1 }
  0xfa   :  { %84 = vsyncpa [#allocation5], 1 }

</bundles_post_ra>
